<compile_context>
chip_gen: v7x
topology: tpu7x:2x2x1
jax: 0.10.0
libtpu: 0.0.40
codegen_flags: <defaults>
</compile_context>

<pallas_src>
import jax
import jax.numpy as jnp
from jax import lax
from jax.experimental import pallas as pl
from jax.experimental.pallas import tpu as pltpu


_MIB = 1024 * 1024
_LANE = 128


def _round_up(v, m):
    return ((v + m - 1) // m) * m


def _vmem_budget():
    """Return (per-x-buffer byte cap, vmem_limit_bytes or None), generation aware."""
    try:
        vmem_cap = int(pltpu.get_tpu_info().vmem_capacity_bytes)
    except Exception:
        # Unknown target (e.g. interpret mode): conservative defaults.
        return 4 * _MIB, None
    # Double-buffered x block dominates the VMEM footprint; keep it well under
    # ~1/4 of physical VMEM per TensorCore.  v7x (64 MiB) -> 8 MiB/buffer,
    # v5e/v6e (128 MiB) -> 12 MiB/buffer (scoped limit raised below).
    per_buf = int(min(12 * _MIB, max(4 * _MIB, vmem_cap // 8)))
    vmem_limit = int(min(64 * _MIB, int(vmem_cap * 0.7)))
    return per_buf, vmem_limit


def _pick_tile(m, n_b, n_c, itemsize, max_bytes_per_buf):
    """Lane-dense M tile: balanced ragged tail + >= 4 grid steps when possible."""
    cap_rows = max(_LANE, (max_bytes_per_buf // (n_c * itemsize)) // _LANE * _LANE)
    if m <= cap_rows:
        tm = m                                   # full-extent block (always legal)
    else:
        n_tiles = pl.cdiv(m, cap_rows)           # balance the tail across tiles
        tm = _round_up(pl.cdiv(m, n_tiles), _LANE)
    # Give v7x's two TensorCores something to split (harmless on 1-TC chips).
    while n_b * pl.cdiv(m, tm) < 4 and tm > 2 * _LANE:
        tm = max(_LANE, _round_up(tm // 2, _LANE))
    return tm


def _make_kernel(tm, chunk):
    """Kernel factory: dot + bias + store sub-tiled over `chunk` lanes of tm."""
    n_full = tm // chunk
    rem = tm - n_full * chunk

    def kernel(w_ref, x_ref, b_ref, o_ref):
        # w_ref: (K, nC) f32 ; x_ref: (nC, tm) ; b_ref: (K, 1) f32 ; o_ref: (K, tm)
        w = w_ref[...]
        b = b_ref[...]

        def do_chunk(off, width):
            xc = x_ref[:, pl.ds(off, width)].astype(jnp.float32)
            acc = jnp.dot(w, xc, preferred_element_type=jnp.float32)
            o_ref[:, pl.ds(off, width)] = (acc + b).astype(o_ref.dtype)

        if n_full > 0:
            def body(c, carry):
                do_chunk(pl.multiple_of(c * chunk, _LANE), chunk)
                return carry
            lax.fori_loop(0, n_full, body, 0, unroll=True)
        if rem > 0:
            do_chunk(n_full * chunk, rem)

    return kernel


def classifier_forward(x, weight, bias, num_anchors=1, *,
                       chunk=1024, tile_override=None, min_pallas_m=512):
    """Pallas TPU forward of the PyTorch `Classifier` module.

    x:      (nB, nC * nA, nH, nW) activations (NCHW, as the module receives)
    weight: (K, nC) or (K, nC, 1, 1, 1) Conv3d weight (kernel-size-1 dims trivial)
    bias:   (K,)
    returns (nB, nA, nH, nW, K), matching `x_class.permute(0, 2, 3, 4, 1)`.
    """
    nB, CnA, nH, nW = x.shape
    nA = int(num_anchors)
    if CnA % nA != 0:
        raise ValueError(f"channel dim {CnA} not divisible by num_anchors {nA}")
    nC = CnA // nA
    K = weight.shape[0]
    w2 = weight.reshape(K, -1).astype(jnp.float32)   # keep weights in f32
    if w2.shape[1] != nC:
        raise ValueError(f"weight has {w2.shape[1]} in-features, expected {nC}")
    if bias.shape != (K,):
        raise ValueError(f"bias shape {bias.shape} != ({K},)")
    b2 = bias.reshape(K, 1).astype(jnp.float32)

    M = nA * nH * nW  # rows per batch element

    # Small-problem fallback: one sub-128-lane grid step + launch overhead
    # loses to XLA's fused einsum.
    if tile_override is None and M < min_pallas_m:
        x5 = x.reshape(nB, nC, nA, nH, nW)
        out = jnp.einsum('bcahw,kc->bahwk', x5.astype(jnp.float32), w2)
        out = out + bias.astype(jnp.float32)
        return out.astype(x.dtype)

    # Free (contiguous) reshape: no data movement, keeps channels leading.
    x3 = x.reshape(nB, nC, M)                        # (nB, nC, M)
    itemsize = jnp.dtype(x.dtype).itemsize
    per_buf, vmem_limit = _vmem_budget()
    chunk = max(_LANE, _round_up(int(chunk), _LANE))
    tm = int(tile_override) if tile_override is not None else _pick_tile(
        M, nB, nC, itemsize, per_buf)
    grid = (nB, pl.cdiv(M, tm))

    cost = pl.CostEstimate(
        flops=2 * nB * M * nC * K,
        transcendentals=0,
        bytes_accessed=(nB * M * nC * itemsize      # activations in
                        + nB * M * K * itemsize     # logits out
                        + K * nC * 4                # weight (f32)
                        + K * 4),                   # bias
    )

    cp_kwargs = dict(dimension_semantics=("parallel", "parallel"))
    if vmem_limit is not None:
        cp_kwargs["vmem_limit_bytes"] = vmem_limit

    out3 = pl.pallas_call(
        _make_kernel(tm, chunk),
        out_shape=jax.ShapeDtypeStruct((nB, K, M), x.dtype),
        grid_spec=pltpu.PrefetchScalarGridSpec(
            num_scalar_prefetch=0,
            grid=grid,
            in_specs=[
                pl.BlockSpec((K, nC), lambda b, j: (0, 0)),            # weight
                pl.BlockSpec((None, nC, tm), lambda b, j: (b, 0, j)),  # x tile
                pl.BlockSpec((K, 1), lambda b, j: (0, 0)),             # bias
            ],
            out_specs=pl.BlockSpec((None, K, tm), lambda b, j: (b, 0, j)),
        ),
        compiler_params=pltpu.CompilerParams(**cp_kwargs),
        cost_estimate=cost,
    )(w2, x3, b2)

    # Output permute in plain JAX.  For the module default K == 1 it is a
    # size-1-axis move (free).
    # TODO(synk): for large K this is a real HBM transpose pass; emit a
    # per-anchor output layout from the kernel if K ever grows large.
    out5 = out3.reshape(nB, K, nA, nH, nW)
    return jnp.transpose(out5, (0, 2, 3, 4, 1))


if __name__ == "__main__":
    # --- Test 1: module-default config on the Pallas path ---------------
    # num_features=128, num_classes=1, num_anchors=1, batch=2, 32x32 map
    # -> M = 1024; tile sizing shrinks tm to 512 so the grid has 4 steps.
    num_features = 128
    num_classes = 1
    num_anchors = 1
    nB, nH, nW = 2, 32, 32

    key = jax.random.PRNGKey(0)
    kx, kw, kb = jax.random.split(key, 3)

    x = jax.random.normal(kx, (nB, num_features * num_anchors, nH, nW),
                          dtype=jnp.float32)
    # Conv3d weight is (K, nC, 1, 1, 1); the kernel-size-1 dims are trivial.
    weight = (jax.random.normal(kw, (num_classes, num_features),
                                dtype=jnp.float32) * 0.05)
    bias = jax.random.normal(kb, (num_classes,), dtype=jnp.float32) * 0.1

    out = classifier_forward(x, weight, bias, num_anchors)
    out = jax.block_until_ready(out)

    x5 = x.reshape(nB, num_features, num_anchors, nH, nW)
    ref = jnp.einsum('bcahw,kc->bahwk', x5, weight) + bias
    assert out.shape == (nB, num_anchors, nH, nW, num_classes)
    assert jnp.allclose(out, ref, atol=1e-4, rtol=1e-4)

    # --- Test 2: ragged tail + in-kernel chunk loop + K > 1, nA > 1 -----
    # M = 2*20*16 = 640 with a forced 256-row tile -> partial last block;
    # chunk=128 exercises the unrolled fori_loop sub-tiling.
    nB2, nH2, nW2, nA2, nC2, K2 = 1, 20, 16, 2, 64, 3
    kx2, kw2, kb2 = jax.random.split(jax.random.PRNGKey(1), 3)
    x2 = jax.random.normal(kx2, (nB2, nC2 * nA2, nH2, nW2), dtype=jnp.float32)
    w2_ = jax.random.normal(kw2, (K2, nC2), dtype=jnp.float32) * 0.05
    b2_ = jax.random.normal(kb2, (K2,), dtype=jnp.float32) * 0.1

    out2 = classifier_forward(x2, w2_, b2_, nA2, chunk=128, tile_override=256)
    out2 = jax.block_until_ready(out2)

    x25 = x2.reshape(nB2, nC2, nA2, nH2, nW2)
    ref2 = jnp.einsum('bcahw,kc->bahwk', x25, w2_) + b2_
    assert out2.shape == (nB2, nA2, nH2, nW2, K2)
    assert jnp.allclose(out2, ref2, atol=1e-4, rtol=1e-4)

    print("KERNEL_OK")
</pallas_src>

<mosaic_0001>
module attributes {stable_mosaic.version = 11 : i64} {
  func.func @kernel(%arg0: i32, %arg1: i32, %arg2: memref<1x128xf32, #tpu.memory_space<vmem>>, %arg3: memref<1x128x512xf32, #tpu.memory_space<vmem>>, %arg4: memref<1x1xf32, #tpu.memory_space<vmem>>, %arg5: memref<1x1x512xf32, #tpu.memory_space<vmem>>) attributes {dimension_semantics = [#tpu.dimension_semantics<parallel>, #tpu.dimension_semantics<parallel>], iteration_bounds = array<i64: 2, 2>, scalar_prefetch = 0 : i64, scratch_operands = 0 : i64, tpu.core_type = #tpu.core_type<tc>, window_params = [{pipeline_mode = #tpu.pipeline_mode<synchronous>, transform_indices = @transform_0, window_bounds = array<i64: 1, 128>}, {transform_indices = @transform_1, window_bounds = array<i64: 1, 128, 512>}, {pipeline_mode = #tpu.pipeline_mode<synchronous>, transform_indices = @transform_2, window_bounds = array<i64: 1, 1>}, {transform_indices = @transform_3, window_bounds = array<i64: 1, 1, 512>}]} {
    %c0 = arith.constant 0 : index
    %c0_0 = arith.constant 0 : index
    %0 = vector.load %arg2[%c0, %c0_0] : memref<1x128xf32, #tpu.memory_space<vmem>>, vector<1x128xf32>
    %c0_1 = arith.constant 0 : index
    %c0_2 = arith.constant 0 : index
    %1 = vector.load %arg4[%c0_1, %c0_2] : memref<1x1xf32, #tpu.memory_space<vmem>>, vector<1x1xf32>
    %c0_3 = arith.constant 0 : index
    %c0_4 = arith.constant 0 : index
    %c0_5 = arith.constant 0 : index
    %2 = vector.load %arg3[%c0_3, %c0_4, %c0_5] : memref<1x128x512xf32, #tpu.memory_space<vmem>>, vector<1x128x512xf32>
    %3 = vector.shape_cast %2 : vector<1x128x512xf32> to vector<128x512xf32>
    %cst = arith.constant dense<0.000000e+00> : vector<1x512xf32>
    %4 = tpu.matmul %0, %3, %cst {dimension_numbers = #tpu.dot_dimension_numbers<[1], [0], [0], [1], [0, 0, 1, 1], [], []>} : vector<1x128xf32>, vector<128x512xf32>, vector<1x512xf32> -> vector<1x512xf32>
    %5 = vector.broadcast %1 : vector<1x1xf32> to vector<1x512xf32>
    %6 = arith.addf %4, %5 : vector<1x512xf32>
    %c0_6 = arith.constant 0 : index
    %c0_7 = arith.constant 0 : index
    %c0_8 = arith.constant 0 : index
    %7 = vector.load %arg5[%c0_6, %c0_7, %c0_8] : memref<1x1x512xf32, #tpu.memory_space<vmem>>, vector<1x1x512xf32>
    %8 = vector.shape_cast %7 : vector<1x1x512xf32> to vector<1x512xf32>
    %9 = vector.shape_cast %6 : vector<1x512xf32> to vector<1x1x512xf32>
    tpu.vector_store %arg5[%c0_6, %c0_7, %c0_8], %9 {strides = array<i32>} : memref<1x1x512xf32, #tpu.memory_space<vmem>>, vector<1x1x512xf32>,
    return
  }
  func.func @transform_0(%arg0: i32, %arg1: i32) -> (i32, i32) {
    %c0_i32 = arith.constant 0 : i32
    %c0_i32_0 = arith.constant 0 : i32
    %c0_i32_1 = arith.constant 0 : i32
    return %c0_i32, %c0_i32_0 : i32, i32
  }
  func.func @transform_1(%arg0: i32, %arg1: i32) -> (i32, i32, i32) {
    %c0_i32 = arith.constant 0 : i32
    %c0_i32_0 = arith.constant 0 : i32
    return %arg0, %c0_i32, %arg1 : i32, i32, i32
  }
  func.func @transform_2(%arg0: i32, %arg1: i32) -> (i32, i32) {
    %c0_i32 = arith.constant 0 : i32
    %c0_i32_0 = arith.constant 0 : i32
    %c0_i32_1 = arith.constant 0 : i32
    return %c0_i32, %c0_i32_0 : i32, i32
  }
  func.func @transform_3(%arg0: i32, %arg1: i32) -> (i32, i32, i32) {
    %c0_i32 = arith.constant 0 : i32
    %c0_i32_0 = arith.constant 0 : i32
    return %arg0, %c0_i32, %arg1 : i32, i32, i32
  }
}

</mosaic_0001>

<bundles_post_ra>
// kernel: tpu_custom_call.1
= control target key start
LH: loop header
LB: loop body
LE: loop exit
PB: predicated region body
PF: predicated region fallthrough
CT: control target
= control target key end

     0   :  { %s1158_s0 = inlined_call_operand.vmem [shape: f32[1,128], index: 0, kind: input, shape index: {}]   ;;  %s1159_s1 = inlined_call_operand.hbm [shape: f32[2,128,1024], index: 1, kind: input, shape index: {}]   ;;  %s1160_s2 = inlined_call_operand.<no memory space> [shape: f32[1,1], index: 2, kind: input, shape index: {}]   ;;  %s1161_s3 = inlined_call_operand.hbm [shape: f32[2,1,1024], index: 3, kind: output, shape index: {}]  }
   0x1   :  { %v8_v0 = vstv %s1160_s2 }
   0x2   :  { %9 = vst [vmem:[#allocation2] sm:$0x1] %v8_v0 }
   0x3   :  { %10 = vsyncpa [#allocation4], 0 }
   0x4   :  { %12 = vsyncpa [#allocation4 + $0x1], 0 }
   0x5   :  { %13 = vsyncpa [#allocation5], 0 }
   0x6   :  { %15 = vsyncpa [#allocation5 + $0x1], 0  ;;  %s893_s14 = smov 0   ;;  %s895_s15 = smov 0  }
   0x7   :  { %s897_s16 = smov 0   ;;  %s899_s17 = smov 0  }
   0x8   :  { %s901_s18 = smov 0   ;;  %s903_s19 = smov 0  }
   0x9   :  { %s905_s20 = smov 0   ;;  %s907_s2 = smov 0  }
   0xa LB: > { %s566_s21 = sadd.s32 4294967295, %s860_s2   ;;  %s567_s22 = sadd.s32 4294967294, %s860_s2   ;;  %s860_s2 = sphi %s907_s2, %s21_s2   ;;  %s856_s20 = sphi %s905_s20, %s1177_s20   ;;  %s852_s19 = sphi %s903_s19, %s1176_s19   ;;  %s848_s18 = sphi %s901_s18, %s1175_s18   ;;  %s844_s17 = sphi %s899_s17, %s1174_s17   ;;  %s840_s16 = sphi %s897_s16, %s1173_s16   ;;  %s836_s15 = sphi %s895_s15, %s1172_s15   ;;  %s832_s14 = sphi %s893_s14, %s1171_s14  }
   0xb   : > { %s30_s23 = sadd.s32 1, %s852_s19  ;;  %s33_s24 = sadd.s32 1, %s856_s20 }
   0xc   : > { %p31_p0 = scmp.ge.s32.totalorder %s30_s23, 2  ;;  %s63_s25 = sadd.s32 1, %s840_s16 }
   0xd   : > { %p70_p1 = scmp.ne.s32.totalorder %s840_s16, %s836_s15  ;;  %p71_p2 = scmp.eq.s32.totalorder %s860_s2, 0 }
   0xe   : > { %s1179_s23 = smov (%p31_p0, %s30_s23), 0  ;;  %s1181_s24 = smov (!%p31_p0, %s33_s24), %s856_s20 }
   0xf   : > { %s59_s26 = ssub.s32 %s852_s19, %s1179_s23  ;;  %p946_p3 = por %p71_p2, %p70_p1 }
  0x10   : > { %p35_p4 = scmp.ge.s32.totalorder %s1181_s24, 2  ;;  %p76_p5 = scmp.ne.s32.totalorder %s836_s15, %s832_s14 }
  0x11   : > { %p77_p6 = scmp.eq.s32.totalorder %s566_s21, 0  ;;  %p123_p7 = scmp.eq.s32.totalorder %s566_s21, 3 }
  0x12   : > { %s1183_s24 = smov (%p35_p4, %s1181_s24), 0  ;;  %p129_p10 = scmp.eq.s32.totalorder %s567_s22, 3 }
  0x13   : > { %p954_p8 = por %p77_p6, %p76_p5  ;;  %p958_p9 = por %p123_p7, %p70_p1 }
  0x14   : > { %s58_s30 = ssub.s32 %s856_s20, %s1183_s24  ;;  %p964_p12 = por %p129_p10, %p76_p5 }
  0x15   : > { %s1165_s29 = scalar_select %p958_p9, 1, 0 }
  0x16   : > { %s60_s4 = sor.u32 %s59_s26, %s58_s30  ;;  %p659_p13 = scmp.lt.s32.totalorder %s860_s2, 4 }
  0x17   : > { %p61_p11 = scmp.eq.s32.totalorder %s60_s4, 0  ;;  %s155_s6 = sand.u32 1, %s840_s16  }
  0x18   : > { %s1166_s5 = scalar_select %p964_p12, 1, 0 }
  0x19   : > { %s971_s7 = scalar_select %p61_p11, %s840_s16, %s63_s25  }
  0x1a   : > { %s570_s8 = sshll.u32 %s155_s6, 9  ;;  %s571_s9 = sshll.u32 %s852_s19, 2 }
  0x1b   : > { %s572_s10 = sshll.u32 %s856_s20, 7  ;;  %s159_s11 = scalar_lea.vmem [#allocation3], %s570_s8 }
  0x1c   : > { %s168_s12 = sshll.u32 %s159_s11, 4  ;;  %s165_s13 = sadd.s32 %s572_s10, %s571_s9  ;;  %s975_s12 = int_to_ptr.vmem [resolvable:$true] %s168_s12 }
  0x1d   : > { %s573_s21 = sshll.u32 %s165_s13, 7  ;;  %p979_p0 = pnand %p659_p13, %p946_p3 }
  0x1e   : > { %s986_s25 = scalar_lea.hbm %s1159_s1, %s573_s21  ;;  %s989_s4 = scalar_lea.sflag [#allocation4], %s155_s6 }
  0x1f   : > { %s732_s8 = scalar_lea.hbm %s986_s25, 8192  ;;  %p734_p3 = pneg %p979_p0 }
  0x20   : > { %p733_p2 = scmp.ne.s32.totalorder %s986_s25, %s732_s8  ;;  %s737_s10 = scalar_lea.hbm %s1159_s1, 32768 }
  0x21   : > { %p738_p6 = scmp.lt.u32.totalorder %s986_s25, %s1159_s1  ;;  %p739_p7 = scmp.lt.u32.totalorder %s737_s10, %s732_s8 }
  0x22   : > { %p735_p4 = pnand %p734_p3, %p733_p2  ;;  %p741_p11 = scmp.lt.u32.totalorder %s732_s8, %s986_s25 }
  0x23   : > { %p740_p10 = por %p739_p7, %p738_p6 }
  0x24   : > { %p736_p5 = pneg %p735_p4 }
  0x25   : > { %p742_p13 = por %p741_p11, %p740_p10 }
  0x27   : > { %p743_p1 = pnand %p742_p13, %p736_p5 }
  0x29   : > { %746 = shalt.err (!%p743_p1)
}
  0x2a   : > { %s747_s6 = scalar_lea.vmem %s975_s12, 8192  ;;  %s862_s21 = smov [#allocation3]  }
  0x2b   : > { %p748_p2 = scmp.ne.s32.totalorder %s975_s12, %s747_s6  ;;  %s752_s26 = sshll.u32 %s862_s21, 4  ;;  %s753_s26 = int_to_ptr.vmem [resolvable:$false] %s752_s26 }
  0x2c   : > { %s754_s30 = scalar_lea.vmem %s753_s26, 16384  ;;  %p755_p9 = scmp.lt.s32.totalorder %s975_s12, %s753_s26 }
  0x2d   : > { %p750_p4 = pnand %p748_p2, %p734_p3  ;;  %p756_p6 = scmp.lt.s32.totalorder %s754_s30, %s747_s6 }
  0x2f   : > { %p751_p12 = pneg %p750_p4  ;;  %p757_p7 = por %p756_p6, %p755_p9 }
  0x31   : > { %p758_p10 = pnand %p757_p7, %p751_p12 }
  0x33   : > { %761 = shalt.err (!%p758_p10)
}
  0x34   : > { %s863_s8 = smov 1024   ;;  %s864_s27 = smov 512  }
  0x35   : > { %s865_s9 = smov 32   ;;  %p176_p1 = scmp.lt.s32.totalorder %s860_s2, 5 }
  0x36   : > { %654 = dma.hbm_to_vmem [thread:$0]  (!%p979_p0), %s986_s25, 8192, %s975_s12, %s989_s4, %s863_s8, %s864_s27, %s865_s9  }
  0x37   : > { %p1168_p3 = scmp.ge.s32.totalorder %s860_s2, 1 }
  0x39   : > { %p177_p5 = pnand %p1168_p3, %p176_p1 }
  0x3a   : > { %s1021_s10 = sand.u32 (!%p177_p5), 1, %s836_s15  }
  0x3b   : > { %180 = sbr.rel (%p177_p5) target bundleno = 341 (0x155), region = 32  ;;  %s575_s11 = sshll.u32 (!%p177_p5), %s1021_s10, 9 }
  0x3c   : > { %s183_s13 = scalar_lea.sflag (!%p177_p5), [#allocation4], %s1021_s10  ;;  %s1025_s6 = scalar_lea.vmem (!%p177_p5), [#allocation3], %s575_s11 }
  0x42   : > { %823 = dma.done.wait (%p954_p8), %s183_s13, 8192  }
  0x43   : > { %825 = vsyncadd (%p954_p8), %s183_s13, 4294959104  ;;  %v866_v1 = vmov 0.0   ;;  %v867_v2 = vmov 0   ;;  %v214_v3 = vld [vmem:[%s1025_s6 + $0x8] sm:$0xff]  ;;  %v216_v5 = vld [vmem:[%s1025_s6 + $0x18] sm:$0xff]  ;;  %s576_s22 = sshll.u32 %s1021_s10, 2 }
  0x44   : > { %350 = vmatprep.mubr.f32.mxu0 %v866_v1  ;;  %421 = vmatprep.mubr.f32.mxu1 %v866_v1  ;;  %v218_v4 = vld [vmem:[%s1025_s6 + $0x28] sm:$0xff]  ;;  %v220_v7 = vld [vmem:[%s1025_s6 + $0x38] sm:$0xff]  ;;  %v213_v8 = vld [vmem:[%s1025_s6] sm:$0xff]  ;;  %s578_s25 = sshll.u32 %s844_s17, 2  ;;  %s579_s4 = sshll.u32 %s848_s18, 3 }
  0x45   : > { %731 = vset.pattern.permute.xlu0 %v867_v2  ;;  %v583_v6 = vpack.c.bf16 %v218_v4, %v214_v3  ;;  %v217_v9 = vld [vmem:[%s1025_s6 + $0x20] sm:$0xff]  ;;  %v615_v10 = vpack.c.bf16 %v220_v7, %v216_v5  ;;  %v215_v12 = vld [vmem:[%s1025_s6 + $0x10] sm:$0xff]  ;;  %v222_v14 = vld [vmem:[%s1025_s6 + $0x48] sm:$0xff]  ;;  %s475_s21 = sadd.s32 %s579_s4, %s578_s25  ;;  %s208_s30 = scalar_lea.vmem [#allocation6], %s576_s22 }
  0x46   : > { %v585_v11 = vpack.c.bf16 %v217_v9, %v213_v8  ;;  %v219_v13 = vld [vmem:[%s1025_s6 + $0x30] sm:$0xff]  ;;  %v226_v16 = vld [vmem:[%s1025_s6 + $0x68] sm:$0xff]  ;;  %v224_v17 = vld [vmem:[%s1025_s6 + $0x58] sm:$0xff]  ;;  %s580_s26 = sshll.u32 %s475_s21, 4  ;;  %s479_s8 = sshll.u32 %s208_s30, 4  ;;  %s1106_s8 = int_to_ptr.vmem [resolvable:$true] %s479_s8 }
  0x47   : > { %584 = vmatprep.subr.bf16.mxu0 %v583_v6  ;;  %v617_v15 = vpack.c.bf16 %v219_v13, %v215_v12  ;;  %v228_v18 = vld [vmem:[%s1025_s6 + $0x78] sm:$0xff]  ;;  %616 = vmatprep.subr.bf16.mxu1 %v615_v10  ;;  %v587_v19 = vpack.c.bf16 %v226_v16, %v222_v14  ;;  %v221_v21 = vld [vmem:[%s1025_s6 + $0x40] sm:$0xff]  ;;  %v223_v23 = vld [vmem:[%s1025_s6 + $0x50] sm:$0xff]  ;;  %s1104_s11 = scalar_lea.hbm %s1161_s3, %s580_s26  ;;  %s463_s17 = scalar_lea.sflag [#allocation5], %s1021_s10 }
  0x48   : > { %586 = vmatpush1.bf16.msra.mxu0 %v585_v11  ;;  %v619_v20 = vpack.c.bf16 %v228_v18, %v224_v17  ;;  %v225_v22 = vld [vmem:[%s1025_s6 + $0x60] sm:$0xff]  ;;  %v227_v25 = vld [vmem:[%s1025_s6 + $0x70] sm:$0xff]  ;;  %v230_v26 = vld [vmem:[%s1025_s6 + $0x88] sm:$0xff]  ;;  %s762_s18 = scalar_lea.vmem %s1106_s8, 64  ;;  %p1169_p9 = scmp.ne.s32.totalorder %s1165_s29, 0 }
  0x49   : > { %618 = vmatpush1.bf16.msra.mxu1 %v617_v15  ;;  %v589_v24 = vpack.c.bf16 %v225_v22, %v221_v21  ;;  %v234_v27 = vld [vmem:[%s1025_s6 + $0xa8] sm:$0xff]  ;;  %588 = vmatprep.subr.bf16.mxu0 %v587_v19  ;;  %v621_v28 = vpack.c.bf16 %v227_v25, %v223_v23  ;;  %v232_v30 = vld [vmem:[%s1025_s6 + $0x98] sm:$0xff]  ;;  %v229_v32 = vld [vmem:[%s1025_s6 + $0x80] sm:$0xff]  ;;  %p763_p8 = scmp.ne.s32.totalorder %s1106_s8, %s762_s18  ;;  %s869_s13 = smov [#allocation6]  }
  0x4a   : > { %620 = vmatprep.subr.bf16.mxu1 %v619_v20  ;;  %v591_v29 = vpack.c.bf16 %v234_v27, %v230_v26  ;;  %v236_v31 = vld [vmem:[%s1025_s6 + $0xb8] sm:$0xff]  ;;  %v233_v34 = vld [vmem:[%s1025_s6 + $0xa0] sm:$0xff]  ;;  %v231_v35 = vld [vmem:[%s1025_s6 + $0x90] sm:$0xff] }
  0x4b   : > { %v623_v33 = vpack.c.bf16 %v236_v31, %v232_v30  ;;  %v235_v36 = vld [vmem:[%s1025_s6 + $0xb0] sm:$0xff]  ;;  %v593_v37 = vpack.c.bf16 %v233_v34, %v229_v32  ;;  %v238_v38 = vld [vmem:[%s1025_s6 + $0xc8] sm:$0xff]  ;;  %v240_v40 = vld [vmem:[%s1025_s6 + $0xd8] sm:$0xff]  ;;  %p764_p12 = pnand %p763_p8, %p1169_p9 }
  0x4c   : > { %590 = vmatpush1.bf16.msra.mxu0 %v589_v24  ;;  %v242_v39 = vld [vmem:[%s1025_s6 + $0xe8] sm:$0xff]  ;;  %v625_v41 = vpack.c.bf16 %v235_v36, %v231_v35  ;;  %v244_v43 = vld [vmem:[%s1025_s6 + $0xf8] sm:$0xff]  ;;  %v237_v44 = vld [vmem:[%s1025_s6 + $0xc0] sm:$0xff] }
  0x4d   : > { %622 = vmatpush1.bf16.msra.mxu1 %v621_v28  ;;  %592 = vmatprep.subr.bf16.mxu0 %v591_v29  ;;  %v595_v42 = vpack.c.bf16 %v242_v39, %v238_v38  ;;  %v241_v45 = vld [vmem:[%s1025_s6 + $0xe0] sm:$0xff]  ;;  %v627_v46 = vpack.c.bf16 %v244_v43, %v240_v40  ;;  %v239_v47 = vld [vmem:[%s1025_s6 + $0xd0] sm:$0xff]  ;;  %v246_v49 = vld [vmem:[%s1025_s6 + $0x108] sm:$0xff]  ;;  %v868_v40 = vmov 1966171168   ;;  %p765_p0 = pneg %p764_p12 }
  0x4e   : > { %624 = vmatprep.subr.bf16.mxu1 %v623_v33  ;;  %v243_v48 = vld [vmem:[%s1025_s6 + $0xf0] sm:$0xff]  ;;  %v250_v50 = vld [vmem:[%s1025_s6 + $0x128] sm:$0xff]  ;;  %v248_v51 = vld [vmem:[%s1025_s6 + $0x118] sm:$0xff]  ;;  %v597_v53 = vpack.c.bf16 %v241_v45, %v237_v44 }
  0x4f   : > { %v252_v52 = vld [vmem:[%s1025_s6 + $0x138] sm:$0xff]  ;;  %v629_v54 = vpack.c.bf16 %v243_v48, %v239_v47  ;;  %v599_v55 = vpack.c.bf16 %v250_v50, %v246_v49  ;;  %v245_v56 = vld [vmem:[%s1025_s6 + $0x100] sm:$0xff]  ;;  %v247_v58 = vld [vmem:[%s1025_s6 + $0x110] sm:$0xff] }
  0x50   : > { %594 = vmatpush1.bf16.msra.mxu0 %v593_v37  ;;  %v249_v57 = vld [vmem:[%s1025_s6 + $0x120] sm:$0xff]  ;;  %v631_v59 = vpack.c.bf16 %v252_v52, %v248_v51  ;;  %v251_v60 = vld [vmem:[%s1025_s6 + $0x130] sm:$0xff]  ;;  %v254_v61 = vld [vmem:[%s1025_s6 + $0x148] sm:$0xff]  ;;  %v282_v37 = vlaneseq }
  0x51   : > { %626 = vmatpush1.bf16.msra.mxu1 %v625_v41  ;;  %596 = vmatprep.subr.bf16.mxu0 %v595_v42  ;;  %v258_v62 = vld [vmem:[%s1025_s6 + $0x168] sm:$0xff]  ;;  %v256_v63 = vld [vmem:[%s1025_s6 + $0x158] sm:$0xff]  ;;  %v601_v1 = vpack.c.bf16 %v249_v57, %v245_v56  ;;  %v633_v2 = vpack.c.bf16 %v251_v60, %v247_v58  ;;  %v253_v4 = vld [vmem:[%s1025_s6 + $0x140] sm:$0xff]  ;;  %v435_v41 = vunpack.c.l.s4 %v868_v40 }
  0x52   : > { %628 = vmatprep.subr.bf16.mxu1 %v627_v46  ;;  %v260_v0 = vld [vmem:[%s1025_s6 + $0x178] sm:$0xff]  ;;  %v603_v3 = vpack.c.bf16 %v258_v62, %v254_v61  ;;  %v257_v5 = vld [vmem:[%s1025_s6 + $0x160] sm:$0xff]  ;;  %v255_v6 = vld [vmem:[%s1025_s6 + $0x150] sm:$0xff]  ;;  %v283_v38 = vshrl.u32 %v282_v37, 7  ;;  %vm459_vm0 = vcmp.lt.s32.totalorder %v282_v37, 512 }
  0x53   : > { %v635_v7 = vpack.c.bf16 %v260_v0, %v256_v63  ;;  %v259_v8 = vld [vmem:[%s1025_s6 + $0x170] sm:$0xff]  ;;  %v262_v9 = vld [vmem:[%s1025_s6 + $0x188] sm:$0xff]  ;;  %v264_v11 = vld [vmem:[%s1025_s6 + $0x198] sm:$0xff]  ;;  %v605_v13 = vpack.c.bf16 %v257_v5, %v253_v4  ;;  %v436_v44 = vunpack.c.0.s8 %v435_v41 }
  0x54   : > { %598 = vmatpush1.bf16.msra.mxu0 %v597_v53  ;;  %v266_v10 = vld [vmem:[%s1025_s6 + $0x1a8] sm:$0xff]  ;;  %v268_v12 = vld [vmem:[%s1025_s6 + $0x1b8] sm:$0xff]  ;;  %v261_v14 = vld [vmem:[%s1025_s6 + $0x180] sm:$0xff]  ;;  %v637_v15 = vpack.c.bf16 %v259_v8, %v255_v6  ;;  %v284_v39 = vsub.s32 0, %v283_v38 }
  0x55   : > { %630 = vmatpush1.bf16.msra.mxu1 %v629_v54  ;;  %600 = vmatprep.subr.bf16.mxu0 %v599_v55  ;;  %v607_v16 = vpack.c.bf16 %v266_v10, %v262_v9  ;;  %v265_v17 = vld [vmem:[%s1025_s6 + $0x1a0] sm:$0xff]  ;;  %v263_v18 = vld [vmem:[%s1025_s6 + $0x190] sm:$0xff]  ;;  %v212_v19 = vld [vmem:[#allocation2] sm:$0x1]  ;;  %v639_v20 = vpack.c.bf16 %v268_v12, %v264_v11  ;;  %v439_v49 = vsub.s32 %v436_v44, %v283_v38 }
  0x56   : > { %632 = vmatprep.subr.bf16.mxu1 %v631_v59  ;;  %v267_v21 = vld [vmem:[%s1025_s6 + $0x1b0] sm:$0xff]  ;;  %v270_v22 = vld [vmem:[%s1025_s6 + $0x1c8] sm:$0xff]  ;;  %279 = vperm.xlu0 %731, %v212_v19   ;;  %v272_v24 = vld [vmem:[%s1025_s6 + $0x1d8] sm:$0xff]  ;;  %v609_v26 = vpack.c.bf16 %v265_v17, %v261_v14 }
  0x57   : > { %v274_v23 = vld [vmem:[%s1025_s6 + $0x1e8] sm:$0xff]  ;;  %v276_v25 = vld [vmem:[%s1025_s6 + $0x1f8] sm:$0xff]  ;;  %v641_v27 = vpack.c.bf16 %v267_v21, %v263_v18  ;;  %v269_v29 = vld [vmem:[%s1025_s6 + $0x1c0] sm:$0xff] }
  0x58   : > { %602 = vmatpush1.bf16.msra.mxu0 %v601_v1  ;;  %v611_v28 = vpack.c.bf16 %v274_v23, %v270_v22  ;;  %v273_v30 = vld [vmem:[%s1025_s6 + $0x1e0] sm:$0xff]  ;;  %v643_v31 = vpack.c.bf16 %v276_v25, %v272_v24  ;;  %v271_v32 = vld [vmem:[%s1025_s6 + $0x1d0] sm:$0xff]  ;;  %v211_v36 = vld [vmem:[%s1158_s0] sm:$0x1] }
  0x59   : > { %634 = vmatpush1.bf16.msra.mxu1 %v633_v2  ;;  %604 = vmatprep.subr.bf16.mxu0 %v603_v3  ;;  %v275_v33 = vld [vmem:[%s1025_s6 + $0x1f0] sm:$0xff]  ;;  %v613_v34 = vpack.c.bf16 %v273_v30, %v269_v29  ;;  %s766_s6 = sshll.u32 %s869_s13, 4  ;;  %s767_s6 = int_to_ptr.vmem [resolvable:$false] %s766_s6 }
  0x5a   : > { %636 = vmatprep.subr.bf16.mxu1 %v635_v7  ;;  %v645_v35 = vpack.c.bf16 %v275_v33, %v271_v32  ;;  %s768_s28 = scalar_lea.vmem %s767_s6, 128  ;;  %p769_p11 = scmp.lt.s32.totalorder %s1106_s8, %s767_s6 }
  0x5b   : > { %p770_p13 = scmp.lt.s32.totalorder %s768_s28, %s762_s18 }
  0x5c   : > { %606 = vmatpush1.bf16.msra.mxu0 %v605_v13 }
  0x5d   : > { %638 = vmatpush1.bf16.msra.mxu1 %v637_v15  ;;  %608 = vmatprep.subr.bf16.mxu0 %v607_v16  ;;  %p771_p2 = por %p770_p13, %p769_p11 }
  0x5e   : > { %640 = vmatprep.subr.bf16.mxu1 %v639_v20 }
  0x5f   : > { %p772_p4 = pnand %p771_p2, %p765_p0 }
  0x60   : > { %610 = vmatpush1.bf16.msra.mxu0 %v609_v26 }
  0x61   : > { %642 = vmatpush1.bf16.msra.mxu1 %v641_v27  ;;  %612 = vmatprep.subr.bf16.mxu0 %v611_v28 }
  0x62   : > { %644 = vmatprep.subr.bf16.mxu1 %v643_v31 }
  0x64   : > { %614 = vmatpush1.bf16.msra.mxu0 %v613_v34 }
  0x65   : > { %646 = vmatpush1.bf16.msra.mxu1 %v645_v35 }
  0x67   : > { %351 = vmatmul.mubr.f32.vlgmr.msra.gmra.mrb[0].mxu0 %v211_v36 }
  0x68   : > { %422 = vmatmul.mubr.f32.vlgmr.msra.gmra.mrb[0].mxu1 %v211_v36 }
  0xd5   : > { %v280_v42 = vpop.permute.xlu0 %279 }
  0xd6   : > { %v285_v43 = vrot.slane %v280_v42, %v284_v39 }
 0x13a   : > { %v352_v45 = vpop.f32.mrb[0].mxu0 }
 0x13b   : > { %v353_v46 = vadd.f32 %v352_v45, %v285_v43  ;;  %v423_v47 = vpop.f32.mrb[0].mxu1  ;;  %v354_v48 = vpop.f32.mrb[1].mxu0 }
 0x13c   : > { %v424_v50 = vadd.f32 %v423_v47, %v285_v43  ;;  %v355_v51 = vadd.f32 %v354_v48, %v285_v43  ;;  %v425_v52 = vpop.f32.mrb[1].mxu1 }
 0x13d   : > { %v426_v53 = vadd.f32 %v425_v52, %v285_v43 }
 0x13e   : > { %v432_v54 = vcombine.low %v353_v46, %v355_v51 }
 0x13f   : > { %v433_v55 = vcombine.low %v424_v50, %v426_v53 }
 0x140   : > { %v440_v56 = vrot.slane %v432_v54, %v439_v49 }
 0x141   : > { %v447_v57 = vrot.slane %v433_v55, %v439_v49 }
 0x143   : > { %v448_v58 = vcombine.low %v440_v56, %v447_v57 }
 0x145   : > { %v455_v59 = vrot.slane %v448_v58, %v439_v49 }
 0x147   : > { %461 = vst.msk [vmem:[%s208_s30] sm:$0xf] %vm459_vm0, %v455_v59 }
 0x148   : > { %775 = shalt.err (!%p772_p4)
}
 0x149   : > { %s776_s10 = scalar_lea.hbm %s1104_s11, 64  ;;  %s780_s25 = scalar_lea.hbm %s1161_s3, 256 }
 0x14a   : > { %p777_p6 = scmp.ne.s32.totalorder %s1104_s11, %s776_s10  ;;  %p781_p1 = scmp.lt.u32.totalorder %s1104_s11, %s1161_s3 }
 0x14b   : > { %p782_p3 = scmp.lt.u32.totalorder %s780_s25, %s776_s10  ;;  %p784_p8 = scmp.lt.u32.totalorder %s776_s10, %s1104_s11 }
 0x14c   : > { %p778_p7 = pnand %p777_p6, %p1169_p9 }
 0x14d   : > { %p783_p5 = por %p782_p3, %p781_p1 }
 0x14e   : > { %p779_p10 = pneg %p778_p7 }
 0x14f   : > { %p785_p12 = por %p784_p8, %p783_p5 }
 0x151   : > { %p786_p0 = pnand %p785_p12, %p779_p10 }
 0x153   : > { %789 = shalt.err (!%p786_p0)
}
 0x154   : > { %649 = dma.vmem_to_hbm [thread:$0]  (%p1169_p9), %s1106_s8, 64, %s1104_s11, %s463_s17  }
 0x155 PF: > { %p660_p11 = scmp.ge.s32.totalorder %s860_s2, 2  ;;  %s491_s26 = sand.u32 1, %s832_s14  }
 0x156   : > { %p1170_p13 = scmp.ne.s32.totalorder %s1166_s5, 0  ;;  %s492_s30 = scalar_lea.sflag [#allocation5], %s491_s26 }
 0x158   : > { %p656_p2 = pnand %p660_p11, %p1170_p13 }
 0x15a   : > { %827 = dma.done.wait (!%p656_p2), %s492_s30, 64  }
 0x15b   : > { %829 = vsyncadd (!%p656_p2), %s492_s30, 4294967232  ;;  %s21_s2 = sadd.s32 1, %s860_s2   ;;  %s1171_s14 = smov %s836_s15 }
 0x15c   : > { %p18_p4 = scmp.ge.s32.totalorder %s21_s2, 6   ;;  %s1172_s15 = smov %s840_s16 }
 0x15d   : > { %s1173_s16 = smov %s971_s7  ;;  %s1174_s17 = smov %s852_s19 }
 0x15e   : > { %s1175_s18 = smov %s856_s20  ;;  %s1176_s19 = smov %s1179_s23 }
 0x15f   : > { %s1177_s20 = smov %s1183_s24  ;;  %20 = sbr.rel (!%p18_p4) target bundleno = 10 (0xa), region = 77 }
 0x166   :  { %497 = vsyncpa [#allocation4], 1 }
 0x167   :  { %499 = vsyncpa [#allocation4 + $0x1], 1 }
 0x168   :  { %500 = vsyncpa [#allocation5], 1 }
 0x169   :  { %502 = vsyncpa [#allocation5 + $0x1], 1 }

</bundles_post_ra>
